<compile_context>
chip_gen: v6e
topology: v6e:2x2x1
jax: 0.10.0
libtpu: 0.0.40
codegen_flags: <defaults>
</compile_context>

<pallas_src>
from functools import partial

import numpy as np
import jax
import jax.numpy as jnp
from jax import lax
from jax.experimental import pallas as pl
from jax.experimental.pallas import tpu as pltpu


def _round_up(x, m):
    return ((x + m - 1) // m) * m


# ----------------------------------------------------------------------------
# Elementwise helpers (used inside kernels)
# ----------------------------------------------------------------------------
def _erf_approx(x):
    # Abramowitz & Stegun 7.1.26, |err| < 1.5e-7 (float32-accurate erf).
    a1, a2, a3, a4, a5 = 0.254829592, -0.284496736, 1.421413741, -1.453152027, 1.061405429
    p = 0.3275911
    s = jnp.where(x >= 0.0, 1.0, -1.0)
    z = jnp.abs(x)
    t = 1.0 / (1.0 + p * z)
    poly = ((((a5 * t + a4) * t + a3) * t + a2) * t + a1) * t
    return s * (1.0 - poly * jnp.exp(-z * z))


def _gelu(x):
    # erf-based GELU, matching torch F.gelu default.
    return 0.5 * x * (1.0 + _erf_approx(x * 0.7071067811865476))


def _layernorm(y, g, b):
    mu = jnp.mean(y, axis=-1, keepdims=True)
    var = jnp.mean((y - mu) ** 2, axis=-1, keepdims=True)
    return (y - mu) * lax.rsqrt(var + 1e-5) * g + b


# ----------------------------------------------------------------------------
# Linear kernel: full K/N per block, only M tiled; fused bias + optional GELU.
# (No K grid axis -> no scratch accumulator / extra VMEM copy.)
# ----------------------------------------------------------------------------
def _linear_kernel(a_ref, w_ref, b_ref, o_ref, *, activation):
    y = jnp.dot(a_ref[...].astype(jnp.bfloat16), w_ref[...],
                preferred_element_type=jnp.float32) + b_ref[...]
    if activation == "gelu":
        y = _gelu(y)
    o_ref[...] = y


def linear_act(a, w, b, activation=None, tm_max=512):
    M, K = a.shape
    N = w.shape[1]
    tm = min(tm_max, _round_up(M, 8))
    Mp = _round_up(M, tm)
    a_p = a.astype(jnp.float32)
    if Mp > M:
        a_p = jnp.pad(a_p, ((0, Mp - M), (0, 0)))
    out = pl.pallas_call(
        partial(_linear_kernel, activation=activation),
        out_shape=jax.ShapeDtypeStruct((Mp, N), jnp.float32),
        grid=(Mp // tm,),
        in_specs=[pl.BlockSpec((tm, K), lambda i: (i, 0)),
                  pl.BlockSpec((K, N), lambda i: (0, 0)),
                  pl.BlockSpec((1, N), lambda i: (0, 0))],
        out_specs=pl.BlockSpec((tm, N), lambda i: (i, 0)),
        compiler_params=pltpu.CompilerParams(
            dimension_semantics=("parallel",)),
    )(a_p, w.astype(jnp.bfloat16), b.astype(jnp.float32).reshape(1, N))
    return out[:M]


# ----------------------------------------------------------------------------
# Fused transformer branch: ALL layers of (MHA + LN + FFN + LN) in one kernel.
# Grid over batch ('parallel'); packed (E,3E) QKV matmul, single out-projection.
# ----------------------------------------------------------------------------
def _branch_kernel(x_ref, win_ref, bin_ref, wout_ref, bout_ref,
                   g1_ref, t1_ref, w1_ref, b1_ref, w2_ref, b2_ref,
                   g2_ref, t2_ref, o_ref, *, num_layers, nh):
    y = x_ref[0]                                       # (S, E) f32
    E = y.shape[-1]
    hd = E // nh
    scale = 1.0 / float(np.sqrt(hd))
    for l in range(num_layers):                        # static unroll over layers
        yb = y.astype(jnp.bfloat16)
        qkv = jnp.dot(yb, win_ref[l],
                      preferred_element_type=jnp.float32) + bin_ref[l]   # (S, 3E)
        heads = []
        for h in range(nh):                            # nh is small & static
            q = qkv[:, h * hd:(h + 1) * hd].astype(jnp.bfloat16)
            k = qkv[:, E + h * hd:E + (h + 1) * hd].astype(jnp.bfloat16)
            v = qkv[:, 2 * E + h * hd:2 * E + (h + 1) * hd].astype(jnp.bfloat16)
            s = lax.dot_general(q, k, (((1,), (1,)), ((), ())),
                                preferred_element_type=jnp.float32) * scale
            m = jnp.max(s, axis=-1, keepdims=True)
            e = jnp.exp(s - m)
            p = e * pl.reciprocal(jnp.sum(e, axis=-1, keepdims=True), approx=True)
            heads.append(jnp.dot(p.astype(jnp.bfloat16), v,
                                 preferred_element_type=jnp.float32))    # (S, hd)
        attn = jnp.concatenate(heads, axis=-1) if nh > 1 else heads[0]   # (S, E)
        attn = jnp.dot(attn.astype(jnp.bfloat16), wout_ref[l],
                       preferred_element_type=jnp.float32) + bout_ref[l]
        y = _layernorm(y + attn, g1_ref[l], t1_ref[l])
        hmid = _gelu(jnp.dot(y.astype(jnp.bfloat16), w1_ref[l],
                             preferred_element_type=jnp.float32) + b1_ref[l])
        ff = jnp.dot(hmid.astype(jnp.bfloat16), w2_ref[l],
                     preferred_element_type=jnp.float32) + b2_ref[l]
        y = _layernorm(y + ff, g2_ref[l], t2_ref[l])
    o_ref[0] = y


def transformer_branch(x, bp):
    B, S, E = x.shape
    L = bp['win'].shape[0]
    H = bp['w1'].shape[-1]

    def fixed(shape):
        return pl.BlockSpec(shape, lambda i, _s=len(shape): (0,) * _s)

    xspec = pl.BlockSpec((1, S, E), lambda i: (i, 0, 0))
    return pl.pallas_call(
        partial(_branch_kernel, num_layers=L, nh=bp['nh']),
        out_shape=jax.ShapeDtypeStruct((B, S, E), jnp.float32),
        grid=(B,),
        in_specs=[xspec,
                  fixed((L, E, 3 * E)), fixed((L, 1, 3 * E)),
                  fixed((L, E, E)), fixed((L, 1, E)),
                  fixed((L, 1, E)), fixed((L, 1, E)),
                  fixed((L, E, H)), fixed((L, 1, H)),
                  fixed((L, H, E)), fixed((L, 1, E)),
                  fixed((L, 1, E)), fixed((L, 1, E))],
        out_specs=xspec,
        compiler_params=pltpu.CompilerParams(dimension_semantics=("parallel",)),
    )(x.astype(jnp.float32), bp['win'], bp['bin'], bp['wout'], bp['bout'],
      bp['g1'], bp['t1'], bp['w1'], bp['b1'], bp['w2'], bp['b2'],
      bp['g2'], bp['t2'])


# ----------------------------------------------------------------------------
# TimesBlock combine: softmax weights + weighted sum + residual (grid over B)
# ----------------------------------------------------------------------------
def _combine_kernel(res_ref, w_ref, x_ref, o_ref, *, k):
    w = w_ref[0]                                    # (1, k)
    m = jnp.max(w, axis=-1, keepdims=True)
    e = jnp.exp(w - m)
    ws = e * pl.reciprocal(jnp.sum(e, axis=-1, keepdims=True), approx=True)
    acc = x_ref[0]                                  # (T, D)
    for i in range(k):
        acc = acc + res_ref[i, 0] * ws[0:1, i:i + 1]
    o_ref[0] = acc


def combine_pallas(res, pw, x):
    k, B, T, D = res.shape
    pw3 = pw.astype(jnp.float32).reshape(B, 1, k)
    return pl.pallas_call(
        partial(_combine_kernel, k=k),
        out_shape=jax.ShapeDtypeStruct((B, T, D), jnp.float32),
        grid=(B,),
        in_specs=[pl.BlockSpec((k, 1, T, D), lambda i: (0, i, 0, 0)),
                  pl.BlockSpec((1, 1, k), lambda i: (i, 0, 0)),
                  pl.BlockSpec((1, T, D), lambda i: (i, 0, 0))],
        out_specs=pl.BlockSpec((1, T, D), lambda i: (i, 0, 0)),
        compiler_params=pltpu.CompilerParams(dimension_semantics=("parallel",)),
    )(res.astype(jnp.float32), pw3, x.astype(jnp.float32))


# ----------------------------------------------------------------------------
# Inception block: 6 parallel 'same' convs merged into ONE equivalent conv,
# stored as per-tap (K*K, Cin, Cout) weight slices for the in-kernel tap loop.
# ----------------------------------------------------------------------------
def merge_inception(kernels):
    """mean_i conv_i(x) (all 'same', centered) == conv(x, mean of zero-padded kernels)."""
    n = len(kernels)
    kmax = kernels[-1][0].shape[-1]
    cout, cin = kernels[0][0].shape[:2]
    wm = np.zeros((cout, cin, kmax, kmax), np.float32)
    bm = np.zeros((cout,), np.float32)
    for w, b in kernels:
        w = np.asarray(jax.device_get(w), np.float32)
        ks = w.shape[-1]
        off = (kmax - ks) // 2
        wm[:, :, off:off + ks, off:off + ks] += w
        bm += np.asarray(jax.device_get(b), np.float32)
    wm, bm = wm / n, bm / n
    # tap t = dh*K + dw  ->  weight slice (Cin, Cout)
    wtap = np.transpose(wm, (2, 3, 1, 0)).reshape(kmax * kmax, cin, cout)
    return {'wtap': jnp.asarray(wtap, jnp.bfloat16),
            'bias': jnp.asarray(bm.reshape(1, cout), jnp.float32),
            'ksize': kmax, 'cout': cout}


# ----------------------------------------------------------------------------
# Fused inc1 + GELU + inc2 per period: in-VMEM tap-accumulation loops, no im2col
# and no HBM intermediate.  Grid over batch ('parallel').
#
# Flat-row trick: the zero-padded image (Hp, Wp, C) is flattened to (Hp*Wp, C);
# a conv tap (dh, dw) is then just a contiguous slice of R = (H-1)*Wp + W rows
# starting at dh*Wp + dw.  Rows whose column index falls in the [W, Wp) gap are
# garbage and are masked to zero (they coincide exactly with padding positions
# the second conv needs to be zero).
# ----------------------------------------------------------------------------
def _inception_pair_kernel(x_ref, mask_ref, w1_ref, b1_ref, w2_ref, b2_ref,
                           o_ref, acc1_ref, hpad_ref, acc2_ref, *, K, Wp, R, pad):
    KK = K * K

    acc1_ref[...] = jnp.zeros(acc1_ref.shape, jnp.float32)

    def tap1(t, carry):
        off = (t // K) * Wp + (t % K)
        patch = x_ref[pl.ds(off, R), :].astype(jnp.bfloat16)      # (R, Cin)
        acc1_ref[...] += jnp.dot(patch, w1_ref[t],
                                 preferred_element_type=jnp.float32)
        return carry

    lax.fori_loop(0, KK, tap1, 0)

    # bias + GELU, mask gap rows to zero, place at the padded offset in VMEM.
    h = _gelu(acc1_ref[...] + b1_ref[...]) * mask_ref[...]
    hpad_ref[...] = jnp.zeros(hpad_ref.shape, hpad_ref.dtype)
    hpad_ref[pl.ds(pad * Wp + pad, R), :] = h

    acc2_ref[...] = jnp.zeros(acc2_ref.shape, jnp.float32)

    def tap2(t, carry):
        off = (t // K) * Wp + (t % K)
        patch = hpad_ref[pl.ds(off, R), :].astype(jnp.bfloat16)   # (R, C1)
        acc2_ref[...] += jnp.dot(patch, w2_ref[t],
                                 preferred_element_type=jnp.float32)
        return carry

    lax.fori_loop(0, KK, tap2, 0)

    o_ref[...] = acc2_ref[...] + b2_ref[...]


_conv_calls = {}


def _get_conv_call(B, NF, Cin, C1, Cout, K, Wp, R, pad):
    key = (B, NF, Cin, C1, Cout, K, Wp, R, pad)
    if key in _conv_calls:
        return _conv_calls[key]
    fn = pl.pallas_call(
        partial(_inception_pair_kernel, K=K, Wp=Wp, R=R, pad=pad),
        out_shape=jax.ShapeDtypeStruct((B, R, Cout), jnp.float32),
        grid=(B,),
        in_specs=[pl.BlockSpec((None, NF, Cin), lambda i: (i, 0, 0)),
                  pl.BlockSpec((R, 1), lambda i: (0, 0)),
                  pl.BlockSpec((K * K, Cin, C1), lambda i: (0, 0, 0)),
                  pl.BlockSpec((1, C1), lambda i: (0, 0)),
                  pl.BlockSpec((K * K, C1, Cout), lambda i: (0, 0, 0)),
                  pl.BlockSpec((1, Cout), lambda i: (0, 0))],
        out_specs=pl.BlockSpec((None, R, Cout), lambda i: (i, 0, 0)),
        scratch_shapes=[pltpu.VMEM((R, C1), jnp.float32),
                        pltpu.VMEM((NF, C1), jnp.float32),
                        pltpu.VMEM((R, Cout), jnp.float32)],
        compiler_params=pltpu.CompilerParams(
            dimension_semantics=("parallel",)),
    )
    fn = jax.jit(fn)          # cached per static config (duplicate periods reuse it)
    _conv_calls[key] = fn
    return fn


def inception_pair(x_btd, inc1, inc2, period):
    """Fused Inception1 -> GELU -> Inception2 on the period-reshaped view of x."""
    B, T, D = x_btd.shape
    p = int(period)
    H = -(-T // p)
    length = H * p
    W = p
    K = inc1['ksize']
    pad = (K - 1) // 2
    C1 = inc1['cout']
    Cout = inc2['cout']
    Hp, Wp = H + 2 * pad, W + 2 * pad
    R = (H - 1) * Wp + W
    NF = Hp * Wp

    xp = x_btd.astype(jnp.float32)
    if length > T:
        xp = jnp.concatenate(
            [xp, jnp.zeros((B, length - T, D), jnp.float32)], axis=1)
    img = xp.reshape(B, H, W, D)
    img = jnp.pad(img, ((0, 0), (pad, pad), (pad, pad), (0, 0)))
    xflat = img.reshape(B, NF, D)

    mask = jnp.asarray(((np.arange(R) % Wp) < W).astype(np.float32).reshape(R, 1))

    fn = _get_conv_call(B, NF, D, C1, Cout, K, Wp, R, pad)
    out = fn(xflat, mask, inc1['wtap'], inc1['bias'],
             inc2['wtap'], inc2['bias'])                     # (B, R, Cout)

    out = jnp.pad(out, ((0, 0), (0, H * Wp - R), (0, 0)))
    out = out.reshape(B, H, Wp, Cout)[:, :, :W, :].reshape(B, length, Cout)
    return out[:, :T, :]


# ----------------------------------------------------------------------------
# FFT period selection + TimesBlock
# ----------------------------------------------------------------------------
def fft_for_period(x, k):
    xf = jnp.fft.rfft(x.astype(jnp.float32), axis=1)         # (B, F, D)
    amp = jnp.abs(xf)
    freq = amp.mean(axis=0).mean(axis=-1)                     # (F,)
    freq = freq.at[0].set(0.0)
    _, top_idx = lax.top_k(freq, k)
    pw = jnp.take(amp.mean(axis=-1), top_idx, axis=1)         # (B, k) — stays on device
    # TODO(synk): data-dependent reshape lengths need concrete ints; only the k top
    #             indices are pulled to host (mirrors torch's .cpu().numpy()).
    top_host = np.maximum(np.asarray(jax.device_get(top_idx)), 1)  # guard idx == 0
    period = x.shape[1] // top_host
    return period, pw


def times_block_forward(x, tp, top_k=3):
    periods, pw = fft_for_period(x, top_k)
    outs = [inception_pair(x, tp['inc1'], tp['inc2'], int(periods[i]))
            for i in range(top_k)]
    res = jnp.stack(outs, axis=0)                             # (k, B, T, D)
    return combine_pallas(res, pw, x)


# ----------------------------------------------------------------------------
# TFBlender forward
# ----------------------------------------------------------------------------
def tfblender_forward(params, price_data, group_data, x_condition):
    B, T, _ = price_data.shape
    if x_condition.ndim == 2:
        x_condition = jnp.broadcast_to(x_condition[:, None, :],
                                       (B, T, x_condition.shape[-1]))
    combined = jnp.concatenate([price_data, group_data, x_condition],
                               axis=2).astype(jnp.float32)            # (B, T, N)
    N = combined.shape[-1]

    x = linear_act(combined.reshape(B * T, N),
                   params['pre_w'], params['pre_b']).reshape(B, T, -1)
    time_x = times_block_forward(x, params['times'])
    time_x = transformer_branch(time_x, params['time_branch'])        # all layers fused

    var_x = jnp.transpose(combined, (0, 2, 1))                        # (B, N, T)
    var_x = transformer_branch(var_x, params['var_branch'])           # all layers fused

    feat = jnp.concatenate([time_x[:, -1, :], var_x[:, :, -1]], axis=1)
    logits = linear_act(feat, params['final_w'], params['final_b'])
    return logits                                                     # (B, 1)


# ----------------------------------------------------------------------------
# Deterministic synthetic parameters
# ----------------------------------------------------------------------------
def init_params(key, *, N_total, seq_len, embed_dim, num_heads, num_layers, num_kernels):
    keys = iter(jax.random.split(key, 1024))

    def nrm(shape, fan):
        return jax.random.normal(next(keys), shape, jnp.float32) / np.sqrt(fan)

    def dense(in_d, out_d):
        return nrm((in_d, out_d), in_d).astype(jnp.bfloat16), jnp.zeros((out_d,), jnp.float32)

    def conv(cin, cout, ks):
        fan = cout * ks * ks                                   # kaiming fan_out
        w = jax.random.normal(next(keys), (cout, cin, ks, ks), jnp.float32) * np.sqrt(2.0 / fan)
        return w, jnp.zeros((cout,), jnp.float32)

    def branch(e):
        h = 4 * e
        return {'nh': num_heads,
                'win': nrm((num_layers, e, 3 * e), e).astype(jnp.bfloat16),
                'bin': jnp.zeros((num_layers, 1, 3 * e), jnp.float32),
                'wout': nrm((num_layers, e, e), e).astype(jnp.bfloat16),
                'bout': jnp.zeros((num_layers, 1, e), jnp.float32),
                'g1': jnp.ones((num_layers, 1, e), jnp.float32),
                't1': jnp.zeros((num_layers, 1, e), jnp.float32),
                'w1': nrm((num_layers, e, h), e).astype(jnp.bfloat16),
                'b1': jnp.zeros((num_layers, 1, h), jnp.float32),
                'w2': nrm((num_layers, h, e), h).astype(jnp.bfloat16),
                'b2': jnp.zeros((num_layers, 1, e), jnp.float32),
                'g2': jnp.ones((num_layers, 1, e), jnp.float32),
                't2': jnp.zeros((num_layers, 1, e), jnp.float32)}

    d_ff_tb = embed_dim * 4
    pre_w, pre_b = dense(N_total, embed_dim)
    final_w, final_b = dense(embed_dim + N_total, 1)
    inc1 = merge_inception([conv(embed_dim, d_ff_tb, 2 * i + 1) for i in range(num_kernels)])
    inc2 = merge_inception([conv(d_ff_tb, embed_dim, 2 * i + 1) for i in range(num_kernels)])
    return {'pre_w': pre_w, 'pre_b': pre_b,
            'times': {'inc1': inc1, 'inc2': inc2},
            'time_branch': branch(embed_dim),
            'var_branch': branch(seq_len),
            'final_w': final_w, 'final_b': final_b}


# ----------------------------------------------------------------------------
if __name__ == "__main__":
    B, T = 2, 8
    price_dim, group_dim, condition_dim = 3, 2, 3
    N_total = price_dim + group_dim + condition_dim          # 8 (== seq_len here)
    embed_dim, num_heads, num_layers = 32, 2, 2

    key = jax.random.PRNGKey(0)
    kp, k1, k2, k3 = jax.random.split(key, 4)
    params = init_params(kp, N_total=N_total, seq_len=T, embed_dim=embed_dim,
                         num_heads=num_heads, num_layers=num_layers, num_kernels=6)

    price_data = jax.random.normal(k1, (B, T, price_dim), jnp.float32)
    group_data = jax.random.normal(k2, (B, T, group_dim), jnp.float32)
    x_condition = jax.random.normal(k3, (B, condition_dim), jnp.float32)   # 2-D path

    logits = tfblender_forward(params, price_data, group_data, x_condition)
    logits = jax.block_until_ready(logits)
    assert logits.shape == (B, 1) and logits.dtype == jnp.float32
    print("KERNEL_OK")
</pallas_src>

<mosaic_0001>
module attributes {stable_mosaic.version = 11 : i64} {
  func.func @_linear_kernel(%arg0: i32, %arg1: memref<16x8xf32, #tpu.memory_space<vmem>>, %arg2: memref<8x32xbf16, #tpu.memory_space<vmem>>, %arg3: memref<1x32xf32, #tpu.memory_space<vmem>>, %arg4: memref<16x32xf32, #tpu.memory_space<vmem>>) attributes {dimension_semantics = [#tpu.dimension_semantics<parallel>], iteration_bounds = array<i64: 1>, scalar_prefetch = 0 : i64, scratch_operands = 0 : i64, tpu.core_type = #tpu.core_type<tc>, window_params = [{transform_indices = @transform_0, window_bounds = array<i64: 16, 8>}, {pipeline_mode = #tpu.pipeline_mode<synchronous>, transform_indices = @transform_1, window_bounds = array<i64: 8, 32>}, {pipeline_mode = #tpu.pipeline_mode<synchronous>, transform_indices = @transform_2, window_bounds = array<i64: 1, 32>}, {transform_indices = @transform_3, window_bounds = array<i64: 16, 32>}]} {
    %c0 = arith.constant 0 : index
    %c0_0 = arith.constant 0 : index
    %0 = vector.load %arg1[%c0, %c0_0] : memref<16x8xf32, #tpu.memory_space<vmem>>, vector<16x8xf32>
    %1 = arith.truncf %0 : vector<16x8xf32> to vector<16x8xbf16>
    %c0_1 = arith.constant 0 : index
    %c0_2 = arith.constant 0 : index
    %2 = vector.load %arg2[%c0_1, %c0_2] : memref<8x32xbf16, #tpu.memory_space<vmem>>, vector<8x32xbf16>
    %cst = arith.constant dense<0.000000e+00> : vector<16x32xf32>
    %3 = tpu.matmul %1, %2, %cst {dimension_numbers = #tpu.dot_dimension_numbers<[1], [0], [0], [1], [0, 0, 1, 1], [], []>} : vector<16x8xbf16>, vector<8x32xbf16>, vector<16x32xf32> -> vector<16x32xf32>
    %c0_3 = arith.constant 0 : index
    %c0_4 = arith.constant 0 : index
    %4 = vector.load %arg3[%c0_3, %c0_4] : memref<1x32xf32, #tpu.memory_space<vmem>>, vector<1x32xf32>
    %5 = vector.broadcast %4 : vector<1x32xf32> to vector<16x32xf32>
    %6 = arith.addf %3, %5 : vector<16x32xf32>
    %c0_5 = arith.constant 0 : index
    %c0_6 = arith.constant 0 : index
    %7 = vector.load %arg4[%c0_5, %c0_6] : memref<16x32xf32, #tpu.memory_space<vmem>>, vector<16x32xf32>
    tpu.vector_store %arg4[%c0_5, %c0_6], %6 {strides = array<i32>} : memref<16x32xf32, #tpu.memory_space<vmem>>, vector<16x32xf32>,
    return
  }
  func.func @transform_0(%arg0: i32) -> (i32, i32) {
    %c0_i32 = arith.constant 0 : i32
    %c0_i32_0 = arith.constant 0 : i32
    return %arg0, %c0_i32 : i32, i32
  }
  func.func @transform_1(%arg0: i32) -> (i32, i32) {
    %c0_i32 = arith.constant 0 : i32
    %c0_i32_0 = arith.constant 0 : i32
    %c0_i32_1 = arith.constant 0 : i32
    return %c0_i32, %c0_i32_0 : i32, i32
  }
  func.func @transform_2(%arg0: i32) -> (i32, i32) {
    %c0_i32 = arith.constant 0 : i32
    %c0_i32_0 = arith.constant 0 : i32
    %c0_i32_1 = arith.constant 0 : i32
    return %c0_i32, %c0_i32_0 : i32, i32
  }
  func.func @transform_3(%arg0: i32) -> (i32, i32) {
    %c0_i32 = arith.constant 0 : i32
    %c0_i32_0 = arith.constant 0 : i32
    return %arg0, %c0_i32 : i32, i32
  }
}

</mosaic_0001>

<bundles_post_ra>
// kernel: tpu_custom_call.1
= control target key start
LH: loop header
LB: loop body
LE: loop exit
PB: predicated region body
PF: predicated region fallthrough
CT: control target
= control target key end

     0   :  { %vm31_vm0 = vcmask 1043456   ;;  %v132_v2 = vmov 0.0   ;;  %vm133_vm1 = vmmov 0   ;;  %vm27_vm2 = vcmask 64512   ;;  %s172_s0 = inlined_call_operand.vmem [shape: f32[16,8], index: 0, kind: input, shape index: {}]   ;;  %s173_s1 = inlined_call_operand.vmem [shape: bf16[8,32], index: 1, kind: input, shape index: {}]   ;;  %s174_s2 = inlined_call_operand.vmem [shape: f32[1,32], index: 2, kind: input, shape index: {}]   ;;  %s175_s3 = inlined_call_operand.hbm [shape: f32[16,32], index: 3, kind: output, shape index: {}]  }
   0x1   :  { %v19_v0 = vld [vmem:[%s173_s1] sm:$0xf]  ;;  %99 = vmatprep.subr.bf16.mxu0 %v132_v2  ;;  %101 = vmatprep.mubr.msk.bf16.mxu0 %vm133_vm1, %v132_v2  ;;  %v17_v4 = vld [vmem:[%s172_s0 + $0x8] sm:$0xff] }
   0x2   :  { %v16_v1 = vld [vmem:[%s172_s0] sm:$0xff]  ;;  %v33_v3 = vsel %vm31_vm0, %v19_v0, 0 }
   0x3   :  { %100 = vmatpush3.bf16.msra.mxu0 %v33_v3  ;;  %v18_v5 = vpack.c.bf16 %v17_v4, %v16_v1 }
   0x4   :  { %8 = vsyncpa [#allocation3], 0  ;;  %v95_v6 = vld [vmem:[%s174_s2] ss:$0 sm:$0xff]  ;;  %vm76_vm3 = vcmask 261120   ;;  %s134_s19 = smov [#allocation2]  }
   0x5   :  { %s84_s20 = sshll.u32 %s134_s19, 4  ;;  %s85_s20 = int_to_ptr.vmem [resolvable:$true] %s84_s20 }
   0x6   :  { %102 = vmatmul.mubr.msk.bf16.vlgmr.msra.gmra.mxu0 %vm27_vm2, %v18_v5  ;;  %s110_s0 = scalar_lea.vmem %s85_s20, 256  ;;  %p115_p1 = scmp.lt.s32.totalorder %s85_s20, %s85_s20 }
   0x7   :  { %p111_p0 = scmp.ne.s32.totalorder %s85_s20, %s110_s0  ;;  %p116_p2 = scmp.lt.s32.totalorder %s110_s0, %s110_s0 }
   0x9   :  { %p117_p3 = por %p116_p2, %p115_p1 }
   0xb   :  { %p118_p4 = pnand %p117_p3, %p111_p0 }
  0xc6   :  { %v69_v7 = vpop.f32.mrf.mxu0 }
  0xc7   :  { %v70_v8 = vadd.f32 %v95_v6, %v69_v7 }
  0xc8   :  { %v103_v9 = vpop.f32.mrf.mxu0 }
  0xc9   :  { %77 = vst.msk [vmem:[#allocation2] sm:$0xff] %vm76_vm3, %v70_v8 }
  0xca   :  { %v72_v10 = vpop.f32.mrf.mxu0 }
  0xcb   :  { %v73_v11 = vadd.f32 %v95_v6, %v72_v10 }
  0xcc   :  { %v104_v12 = vpop.f32.mrf.mxu0 }
  0xcd   :  { %78 = vst.msk [vmem:[#allocation2 + $0x8] sm:$0xff] %vm76_vm3, %v73_v11 }
  0xce   :  { %121 = shalt.err (!%p118_p4)
}
  0xcf   :  { %s135_s2 = smov 128   ;;  %s136_s21 = smov 8  }
  0xd0   :  { %90 = dma.vmem_to_hbm [thread:$0]  %s85_s20, 256, %s175_s3, [#allocation3], %s135_s2, %s135_s2, %s136_s21  }
  0xd1   :  { %130 = dma.done.wait [#allocation3], 256  }
  0xd2   :  { %131 = vsyncadd [#allocation3], 4294967040 }
  0xd3   :  { %94 = vsyncpa [#allocation3], 1 }

</bundles_post_ra>
